<compile_context>
chip_gen: v6e
topology: v6e:2x2x1
jax: 0.10.0
libtpu: 0.0.40
codegen_flags: <defaults>
</compile_context>

<pallas_src>
import functools

import jax
import jax.numpy as jnp
import numpy as np
from jax.experimental import pallas as pl
from jax.experimental.pallas import tpu as pltpu

_LANE = 128
_SUBLANE = 8


def _round_up(x, m):
    return ((x + m - 1) // m) * m


def _clip_sample_kernel(tf_ref, out_ref, *, sampling_rate, n_valid, oob_option):
    """Strided frame indices with OOB fixup for one row-tile.

    tf_ref : (tile_rows, 1) int32 VMEM  -- total_frames per row (pad rows hold 1)
    out_ref: (tile_rows, N_pad) int32 VMEM -- lane-dense output
    """
    rows, n_pad = out_ref.shape
    # idx[b, i] = i * sampling_rate  (same for every row; >=2-D iota on TPU).
    idx = jax.lax.broadcasted_iota(jnp.int32, (rows, n_pad), 1) * jnp.int32(sampling_rate)

    tf = tf_ref[...]                      # (rows, 1) column, broadcasts over lanes
    # torch would raise for total_frames <= 0; we clamp to 1 instead (documented
    # divergence) so the divide-free mod below stays well defined.
    tf_safe = jnp.maximum(tf, 1)

    if oob_option == "loop":
        # idx mod tf without an emulated integer divide-by-runtime-scalar:
        #   q = floor(idx * rcp(tf)) on the EUP, r = idx - q*tf, one +/-1 fixup.
        # Exact while the quotient error is <= 1, guaranteed for idx < 2^23 with
        # the exact (approx=False) f32 reciprocal; the wrapper asserts that bound.
        # Do NOT switch to approx=True without adding a second fixup step.
        inv_tf = pl.reciprocal(tf_safe.astype(jnp.float32), approx=False)
        q = jnp.floor(idx.astype(jnp.float32) * inv_tf).astype(jnp.int32)
        r = idx - q * tf_safe
        r = jnp.where(r >= tf_safe, r - tf_safe, r)
        r = jnp.where(r < 0, r + tf_safe, r)
        out_ref[...] = r
    else:  # "repeat_last"
        # Largest valid index = max{ i*sr : i*sr < tf, i < n_valid }
        #                     = min((tf-1)//sr, n_valid-1) * sr
        # sr is a compile-time constant -> the divide lowers to mul/shift; no
        # cross-lane reduction is needed (it is per-row anyway).
        last_i = jnp.minimum((tf_safe - 1) // jnp.int32(sampling_rate),
                             jnp.int32(n_valid - 1))
        last_valid = last_i * jnp.int32(sampling_rate)            # (rows, 1)
        out_ref[...] = jnp.where(idx < tf, idx, last_valid)


def temporal_clip_sample(total_frames, *, clip_len, sampling_rate, num_clips,
                         oob_option="loop", return_padded=False, row_tile=512):
    """JAX/Pallas equivalent of TemporalClipSample.forward (num_clips != -1).

    `total_frames` may be a scalar or a (B,) vector; returns
    (frame_indices, num_clips, clip_len, sampling_rate) where frame_indices is
    (N,) for a scalar input or (B, N) for a batched input, N = num_clips*clip_len.

    With return_padded=True the raw (B_pad, N_pad) buffer is returned instead
    (rows >= B hold indices computed with total_frames=1, columns >= N hold the
    strided continuation); use it when the consumer can mask/ignore the pad and
    you want to skip the extra HBM slicing pass.
    """
    assert oob_option in ("loop", "repeat_last")
    # TODO(synk): num_clips == -1 (and drop_last) make the output length depend
    # on the runtime total_frames (dynamic shape); no static-shape Pallas
    # equivalent, so only the fixed-num_clips branch is implemented.
    assert num_clips != -1, "num_clips must be fixed for a static output shape"

    n = clip_len * num_clips
    n_pad = _round_up(n, _LANE)                      # lane-dense store
    idx_max = (n_pad - 1) * sampling_rate
    if oob_option == "loop":
        # Bound under which the reciprocal-mod + single +/-1 fixup is exact.
        assert idx_max < (1 << 23), (
            f"loop path requires (N_pad-1)*sampling_rate < 2^23, got {idx_max}")

    tf = jnp.asarray(total_frames, jnp.int32)
    squeeze = (tf.ndim == 0)
    tf = jnp.atleast_1d(tf)                          # (B,)
    b = tf.shape[0]

    # Row tiling: sublane-aligned, capped at row_tile so each double-buffered
    # output block stays small (512 x 128 x 4B = 256 KiB) on every chip.
    tile_rows = _round_up(min(row_tile, _round_up(b, _SUBLANE)), _SUBLANE)
    b_pad = _round_up(b, tile_rows)
    grid = (b_pad // tile_rows,)

    # Padded rows get tf=1 via a single lax.pad (no ones+scatter kernel).
    tf_col = jnp.pad(tf, (0, b_pad - b), constant_values=1)[:, None]

    out = pl.pallas_call(
        functools.partial(_clip_sample_kernel,
                          sampling_rate=sampling_rate,
                          n_valid=n,
                          oob_option=oob_option),
        out_shape=jax.ShapeDtypeStruct((b_pad, n_pad), jnp.int32),
        grid=grid,
        in_specs=[pl.BlockSpec((tile_rows, 1), lambda i: (i, 0))],
        out_specs=pl.BlockSpec((tile_rows, n_pad), lambda i: (i, 0)),
        compiler_params=pltpu.CompilerParams(
            dimension_semantics=("parallel",)),
    )(tf_col)

    if return_padded:
        return out, num_clips, clip_len, sampling_rate

    frame_indices = out[:b, :n]
    if squeeze:
        frame_indices = frame_indices[0]
    return frame_indices, num_clips, clip_len, sampling_rate


def _ref_forward(total_frames, clip_len, sampling_rate, num_clips, oob_option):
    """NumPy reference reproducing the torch module (num_clips != -1 branch)."""
    frame_indices = np.arange(0, clip_len * sampling_rate * num_clips,
                              sampling_rate)
    if np.any(frame_indices >= total_frames):
        if oob_option == "loop":
            frame_indices = np.mod(frame_indices, total_frames)
        elif oob_option == "repeat_last":
            last_valid = np.max(frame_indices[frame_indices < total_frames])
            frame_indices = frame_indices.copy()
            frame_indices[frame_indices >= total_frames] = last_valid
    return frame_indices.astype(np.int32)


def _check_batch(tf_np, clip_len, sampling_rate, num_clips, oob_option):
    n = clip_len * num_clips
    fidx, nclips, clen, srate = temporal_clip_sample(
        jnp.asarray(tf_np, jnp.int32),
        clip_len=clip_len, sampling_rate=sampling_rate, num_clips=num_clips,
        oob_option=oob_option)
    fidx = np.asarray(jax.block_until_ready(fidx))
    assert fidx.shape == (tf_np.shape[0], n)
    for row, tf_val in enumerate(tf_np):
        ref = _ref_forward(int(tf_val), clip_len, sampling_rate, num_clips,
                           oob_option)
        if not np.array_equal(fidx[row], ref):
            raise AssertionError(
                f"mismatch for oob_option={oob_option}, tf={int(tf_val)}:\n"
                f"kernel={fidx[row]}\nref={ref}")
    assert nclips == num_clips and clen == clip_len and srate == sampling_rate


if __name__ == "__main__":
    clip_len = 16
    sampling_rate = 2
    num_clips = 4
    n = clip_len * num_clips

    key = jax.random.PRNGKey(0)
    k_small, k_large = jax.random.split(key)

    # Small batch: some total_frames shorter than the sampled span (OOB fixup
    # exercised), some longer (identity path).
    tf_small = np.asarray(jax.random.randint(k_small, (5,), minval=10,
                                             maxval=200, dtype=jnp.int32))
    # Larger batch to exercise the row grid (tile_rows=512 -> grid=(2,)).
    tf_large = np.asarray(jax.random.randint(k_large, (700,), minval=5,
                                             maxval=400, dtype=jnp.int32))

    for oob_option in ("loop", "repeat_last"):
        _check_batch(tf_small, clip_len, sampling_rate, num_clips, oob_option)
        _check_batch(tf_large, clip_len, sampling_rate, num_clips, oob_option)

        # Scalar call (matches the original torch module interface).
        fidx_s, _, _, _ = temporal_clip_sample(
            int(tf_small[0]),
            clip_len=clip_len, sampling_rate=sampling_rate,
            num_clips=num_clips, oob_option=oob_option)
        fidx_s = np.asarray(jax.block_until_ready(fidx_s))
        ref_s = _ref_forward(int(tf_small[0]), clip_len, sampling_rate,
                             num_clips, oob_option)
        if not np.array_equal(fidx_s, ref_s):
            raise AssertionError(
                f"scalar mismatch for oob_option={oob_option}:\n"
                f"kernel={fidx_s}\nref={ref_s}")

        # Padded-output path (consumer-side masking): shape check only.
        fidx_p, _, _, _ = temporal_clip_sample(
            jnp.asarray(tf_small, jnp.int32),
            clip_len=clip_len, sampling_rate=sampling_rate,
            num_clips=num_clips, oob_option=oob_option, return_padded=True)
        fidx_p = np.asarray(jax.block_until_ready(fidx_p))
        assert fidx_p.shape[1] % _LANE == 0 and fidx_p.shape[0] % _SUBLANE == 0
        assert np.array_equal(fidx_p[: tf_small.shape[0], :n],
                              np.asarray(jax.block_until_ready(
                                  temporal_clip_sample(
                                      jnp.asarray(tf_small, jnp.int32),
                                      clip_len=clip_len,
                                      sampling_rate=sampling_rate,
                                      num_clips=num_clips,
                                      oob_option=oob_option)[0])))

    print("KERNEL_OK")
</pallas_src>

<mosaic_0001>
module attributes {stable_mosaic.version = 11 : i64} {
  func.func @_clip_sample_kernel(%arg0: i32, %arg1: memref<8x1xi32, #tpu.memory_space<vmem>>, %arg2: memref<8x128xi32, #tpu.memory_space<vmem>>) attributes {dimension_semantics = [#tpu.dimension_semantics<parallel>], iteration_bounds = array<i64: 1>, scalar_prefetch = 0 : i64, scratch_operands = 0 : i64, tpu.core_type = #tpu.core_type<tc>, window_params = [{transform_indices = @transform_0, window_bounds = array<i64: 8, 1>}, {transform_indices = @transform_1, window_bounds = array<i64: 8, 128>}]} {
    %0 = tpu.iota {dimensions = array<i32: 1>} : vector<8x128xi32>
    %c2_i32 = arith.constant 2 : i32
    %1 = vector.broadcast %c2_i32 : i32 to vector<8x128xi32>
    %2 = arith.muli %0, %1 : vector<8x128xi32>
    %c0 = arith.constant 0 : index
    %c0_0 = arith.constant 0 : index
    %3 = vector.load %arg1[%c0, %c0_0] : memref<8x1xi32, #tpu.memory_space<vmem>>, vector<8x1xi32>
    %c1_i32 = arith.constant 1 : i32
    %4 = vector.broadcast %c1_i32 : i32 to vector<8x1xi32>
    %5 = arith.maxsi %3, %4 : vector<8x1xi32>
    %6 = arith.sitofp %5 : vector<8x1xi32> to vector<8x1xf32>
    %7 = tpu.reciprocal %6 : vector<8x1xf32> -> vector<8x1xf32>
    %8 = arith.sitofp %2 : vector<8x128xi32> to vector<8x128xf32>
    %9 = vector.broadcast %7 : vector<8x1xf32> to vector<8x128xf32>
    %10 = arith.mulf %8, %9 : vector<8x128xf32>
    %11 = math.floor %10 : vector<8x128xf32>
    %12 = arith.fptosi %11 : vector<8x128xf32> to vector<8x128xi32>
    %13 = vector.broadcast %5 : vector<8x1xi32> to vector<8x128xi32>
    %14 = arith.muli %12, %13 : vector<8x128xi32>
    %15 = arith.subi %2, %14 : vector<8x128xi32>
    %16 = vector.broadcast %5 : vector<8x1xi32> to vector<8x128xi32>
    %17 = arith.cmpi sge, %15, %16 : vector<8x128xi32>
    %18 = vector.broadcast %5 : vector<8x1xi32> to vector<8x128xi32>
    %19 = arith.subi %15, %18 : vector<8x128xi32>
    %20 = arith.select %17, %19, %15 : vector<8x128xi1>, vector<8x128xi32>
    %c0_i32 = arith.constant 0 : i32
    %21 = vector.broadcast %c0_i32 : i32 to vector<8x128xi32>
    %22 = arith.cmpi slt, %20, %21 : vector<8x128xi32>
    %23 = vector.broadcast %5 : vector<8x1xi32> to vector<8x128xi32>
    %24 = arith.addi %20, %23 : vector<8x128xi32>
    %25 = arith.select %22, %24, %20 : vector<8x128xi1>, vector<8x128xi32>
    %c0_1 = arith.constant 0 : index
    %c0_2 = arith.constant 0 : index
    %26 = vector.load %arg2[%c0_1, %c0_2] : memref<8x128xi32, #tpu.memory_space<vmem>>, vector<8x128xi32>
    tpu.vector_store %arg2[%c0_1, %c0_2], %25 {strides = array<i32>} : memref<8x128xi32, #tpu.memory_space<vmem>>, vector<8x128xi32>,
    return
  }
  func.func @transform_0(%arg0: i32) -> (i32, i32) {
    %c0_i32 = arith.constant 0 : i32
    %c0_i32_0 = arith.constant 0 : i32
    return %arg0, %c0_i32 : i32, i32
  }
  func.func @transform_1(%arg0: i32) -> (i32, i32) {
    %c0_i32 = arith.constant 0 : i32
    %c0_i32_0 = arith.constant 0 : i32
    return %arg0, %c0_i32 : i32, i32
  }
}

</mosaic_0001>

<bundles_post_ra>
// kernel: tpu_custom_call.1
= control target key start
LH: loop header
LB: loop body
LE: loop exit
PB: predicated region body
PF: predicated region fallthrough
CT: control target
= control target key end

     0   :  { %s99_s0 = inlined_call_operand.vmem [shape: s32[8,1], index: 0, kind: input, shape index: {}]   ;;  %s100_s1 = inlined_call_operand.hbm [shape: s32[8,128], index: 1, kind: output, shape index: {}]  }
   0x1   :  { %v12_v0 = vld [vmem:[%s99_s0] sm:$0xff] }
   0x2   :  { %6 = vsyncpa [#allocation3], 0  ;;  %v81_v1 = vmov 0   ;;  %vm13_vm0 = vcmp.gt.s32.totalorder %v12_v0, 1  ;;  %v9_v5 = vlaneseq  ;;  %s82_s0 = smov [#allocation2]  }
   0x3   :  { %56 = vset.pattern.permute.xlu0 %v81_v1  ;;  %v14_v2 = vsel %vm13_vm0, %v12_v0, 1  ;;  %s44_s8 = sshll.u32 %s82_s0, 4  ;;  %s45_s8 = int_to_ptr.vmem [resolvable:$true] %s44_s8 }
   0x4   :  { %v15_v3 = vcvt.s32.f32 %v14_v2  ;;  %v10_v6 = vand.u32 127, %v9_v5  ;;  %s59_s9 = scalar_lea.vmem %s45_s8, 128  ;;  %p64_p1 = scmp.lt.s32.totalorder %s45_s8, %s45_s8 }
   0x5   :  { %p60_p0 = scmp.ne.s32.totalorder %s45_s8, %s59_s9  ;;  %p65_p2 = scmp.lt.s32.totalorder %s59_s9, %s59_s9 }
   0x6   :  { %57 = vrcp.f32 %v15_v3  ;;  %v11_v7 = vmul.u32 2, %v10_v6 }
   0x7   :  { %p66_p3 = por %p65_p2, %p64_p1 }
   0x8   :  { %v17_v8 = vcvt.s32.f32 %v11_v7 }
   0x9   :  { %p67_p4 = pnand %p66_p3, %p60_p0 }
  0x13   :  { %v58_v4 = vpop.eup %57 }
  0x14   :  { %20 = vperm.xlu0 %56, %v58_v4  }
  0x18   :  { %27 = vperm.xlu0 %56, %v14_v2  }
  0x8f   :  { %v21_v9 = vpop.permute.xlu0 %20 }
  0x90   :  { %v23_v10 = vmul.f32 %v21_v9, %v17_v8 }
  0x92   :  { %v24_v11 = vfloor.f32 %v23_v10 }
  0x93   :  { %v28_v14 = vpop.permute.xlu0 %27 }
  0x94   :  { %v52_v12 = vtrunc.f32 %v24_v11 }
  0x96   :  { %v53_v13 = vcvt.f32.s32 %v52_v12 }
  0x98   :  { %v29_v15 = vmul.u32 %v53_v13, %v28_v14 }
  0x9a   :  { %v30_v16 = vsub.s32 %v11_v7, %v29_v15 }
  0x9c   :  { %vm31_vm1 = vcmp.ge.s32.totalorder %v30_v16, %v28_v14  ;;  %v32_v17 = vsub.s32 %v30_v16, %v28_v14 }
  0x9e   :  { %v33_v18 = vsel %vm31_vm1, %v32_v17, %v30_v16 }
  0x9f   :  { %v35_v19 = vadd.s32 %v33_v18, %v28_v14  ;;  %vm34_vm2 = vcmp.lt.s32.totalorder %v33_v18, 0 }
  0xa1   :  { %v36_v20 = vsel %vm34_vm2, %v35_v19, %v33_v18 }
  0xa2   :  { %37 = vst [vmem:[#allocation2] sm:$0xff] %v36_v20 }
  0xa3   :  { %70 = shalt.err (!%p67_p4)
}
  0xa4   :  { %47 = dma.vmem_to_hbm [thread:$0]  %s45_s8, 128, %s100_s1, [#allocation3]  }
  0xa5   :  { %79 = dma.done.wait [#allocation3], 128  }
  0xa6   :  { %80 = vsyncadd [#allocation3], 4294967168 }
  0xa7   :  { %51 = vsyncpa [#allocation3], 1 }

</bundles_post_ra>
